<compile_context>
chip_gen: v7x
topology: tpu7x:2x2x1
jax: 0.10.0
libtpu: 0.0.40
codegen_flags: <defaults>
</compile_context>

<pallas_src>
import jax
import jax.numpy as jnp
from jax.experimental import pallas as pl
from jax.experimental.pallas import tpu as pltpu


def _round_up(x, m):
    return (x + m - 1) // m * m


def _cdiv(a, b):
    return (a + b - 1) // b


def _global_attn_kernel(x_ref, w1_ref, b1_ref, w2_ref, b2_ref, o_ref):
    """Process one (1, C, tile_rows, 128) sublane/lane-dense tile.

    x_ref / o_ref : (1, C, TR, 128) in VMEM -- each channel slab x_ref[0, c]
                    is a dense (TR, 128) array.
    w1_ref (Cr, C), b1_ref (Cr,), w2_ref (C, Cr), b2_ref (C,) : SMEM scalars.

    C and Cr are tiny for this module (in_channel=4, ratio=4 => C=4, Cr=1), so
    both 1x1x1 convs are statically unrolled VPU broadcast-FMAs; no MXU.
    # TODO(synk): for large C (e.g. 512) switch to an MXU matmul formulation
    # with 128/256-aligned channel tiles instead of the unrolled VPU path.
    """
    C = o_ref.shape[1]
    Cr = b1_ref.shape[0]

    # Load each channel slab once, compute in f32.
    xs = [x_ref[0, c].astype(jnp.float32) for c in range(C)]  # (TR, 128) each

    # conv1: h_j = relu( sum_c W1[j,c] * x_c + b1[j] )
    hs = []
    for j in range(Cr):
        acc = w1_ref[j, 0] * xs[0] + b1_ref[j]
        for c in range(1, C):
            acc = acc + w1_ref[j, c] * xs[c]
        hs.append(jnp.maximum(acc, 0.0))

    # conv2 + sigmoid: y_c = sigmoid( sum_j W2[c,j] * h_j + b2[c] )
    # sigmoid(x) = 0.5 * tanh(0.5 * x) + 0.5  -> one EUP op per element.
    for c in range(C):
        acc = w2_ref[c, 0] * hs[0] + b2_ref[c]
        for j in range(1, Cr):
            acc = acc + w2_ref[c, j] * hs[j]
        y = 0.5 * jnp.tanh(0.5 * acc) + 0.5
        o_ref[0, c] = y.astype(o_ref.dtype)  # direct per-channel dense store


def global_attn_pallas(x_ncdhw, w1, b1, w2, b2, *, max_tile_rows=2048):
    """x_ncdhw: (N, C, D, H, W).
    w1: (Cr, C)  b1: (Cr,)   -- Conv3d(C, Cr, kernel_size=1) with 1x1x1 squeezed.
    w2: (C, Cr)  b2: (C,)    -- Conv3d(Cr, C, kernel_size=1).
    Returns (N, C, D, H, W), same dtype as x.
    """
    N, C, D, H, W = x_ncdhw.shape
    S = D * H * W

    # Channels-first; flatten spatial and fold onto (rows, 128 lanes).
    x = x_ncdhw.reshape(N, C, S)
    S128 = _round_up(S, 128)
    if S128 != S:
        # Tiny pad (< 128 elems per (n,c)) only when D*H*W isn't lane-aligned.
        x = jnp.pad(x, ((0, 0), (0, 0), (0, S128 - S)))
    R = S128 // 128
    x = x.reshape(N, C, R, 128)  # contiguous reshape: free

    # Row-tile selection: full extent if it fits, else a multiple of 8.
    tile_rows = min(max_tile_rows, R)
    if tile_rows != R:
        tile_rows = max(8, tile_rows // 8 * 8)
    # v7x megacore: give the parallel grid >= 2 steps when N == 1.
    if N == 1 and tile_rows == R and R >= 16:
        tile_rows = _round_up(_cdiv(R, 2), 8)

    grid = (N, _cdiv(R, tile_rows))  # ragged last block is masked by Pallas

    smem_spec = pl.BlockSpec(memory_space=pltpu.MemorySpace.SMEM)
    out = pl.pallas_call(
        _global_attn_kernel,
        out_shape=jax.ShapeDtypeStruct((N, C, R, 128), x.dtype),
        grid=grid,
        in_specs=[
            pl.BlockSpec((1, C, tile_rows, 128), lambda n, r: (n, 0, r, 0)),
            smem_spec,  # w1 (Cr, C)
            smem_spec,  # b1 (Cr,)
            smem_spec,  # w2 (C, Cr)
            smem_spec,  # b2 (C,)
        ],
        out_specs=pl.BlockSpec((1, C, tile_rows, 128), lambda n, r: (n, 0, r, 0)),
        compiler_params=pltpu.CompilerParams(
            dimension_semantics=("parallel", "parallel"),
            vmem_limit_bytes=48 * 1024 * 1024,
        ),
    )(x, w1, b1, w2, b2)

    out = out.reshape(N, C, S128)
    if S128 != S:
        out = out[:, :, :S]
    return out.reshape(N, C, D, H, W)


def global_attn_ref(x_ncdhw, w1, b1, w2, b2):
    """Pure-JAX reference matching the PyTorch module."""
    h = jnp.einsum("ncdhw,oc->nodhw", x_ncdhw, w1) + b1[None, :, None, None, None]
    h = jnp.maximum(h, 0.0)
    y = jnp.einsum("ncdhw,oc->nodhw", h, w2) + b2[None, :, None, None, None]
    return jax.nn.sigmoid(y)


def _run_case(key, shape, ratio=4, **kw):
    N, C, D, H, W = shape
    Cr = max(1, C // ratio)
    kx, kw1, kb1, kw2, kb2 = jax.random.split(key, 5)
    x = jax.random.normal(kx, shape, dtype=jnp.float32)
    # Conv3d weights (kernel_size=1) with the 1x1x1 spatial dims squeezed.
    w1 = jax.random.normal(kw1, (Cr, C), dtype=jnp.float32) * 0.5
    b1 = jax.random.normal(kb1, (Cr,), dtype=jnp.float32) * 0.1
    w2 = jax.random.normal(kw2, (C, Cr), dtype=jnp.float32) * 0.5
    b2 = jax.random.normal(kb2, (C,), dtype=jnp.float32) * 0.1

    out = jax.block_until_ready(global_attn_pallas(x, w1, b1, w2, b2, **kw))
    ref = global_attn_ref(x, w1, b1, w2, b2)
    assert out.shape == shape
    assert jnp.allclose(out, ref, atol=1e-5, rtol=1e-5), f"mismatch for {shape}"


if __name__ == "__main__":
    key = jax.random.PRNGKey(0)
    k1, k2, k3 = jax.random.split(key, 3)

    # 1) Base case: in_channel=4, ratio=4 -> hidden=1, S = 512 (lane-aligned).
    _run_case(k1, (2, 4, 8, 8, 8))

    # 2) Ragged row-blocks: S = 1920 -> R = 15, tile_rows = 8 -> masked last block.
    _run_case(k2, (1, 4, 10, 12, 16), max_tile_rows=8)

    # 3) Non-lane-aligned spatial size: S = 105 -> small pad to 128, sliced off.
    _run_case(k3, (1, 4, 3, 5, 7))

    print("KERNEL_OK")
</pallas_src>

<mosaic_0001>
module attributes {stable_mosaic.version = 11 : i64} {
  func.func @_global_attn_kernel(%arg0: i32, %arg1: i32, %arg2: memref<1x4x4x128xf32, #tpu.memory_space<vmem>>, %arg3: memref<1x4xf32, #tpu.memory_space<smem>>, %arg4: memref<1xf32, #tpu.memory_space<smem>>, %arg5: memref<4x1xf32, #tpu.memory_space<smem>>, %arg6: memref<4xf32, #tpu.memory_space<smem>>, %arg7: memref<1x4x4x128xf32, #tpu.memory_space<vmem>>) attributes {dimension_semantics = [#tpu.dimension_semantics<parallel>, #tpu.dimension_semantics<parallel>], iteration_bounds = array<i64: 2, 1>, scalar_prefetch = 0 : i64, scratch_operands = 0 : i64, tpu.core_type = #tpu.core_type<tc>, window_params = [{transform_indices = @transform_0, window_bounds = array<i64: 1, 4, 4, 128>}, {transform_indices = @transform_1, window_bounds = array<i64: 1, 4>}, {transform_indices = @transform_2, window_bounds = array<i64: 1>}, {transform_indices = @transform_3, window_bounds = array<i64: 4, 1>}, {transform_indices = @transform_4, window_bounds = array<i64: 4>}, {transform_indices = @transform_5, window_bounds = array<i64: 1, 4, 4, 128>}]} {
    %c0 = arith.constant 0 : index
    %c0_0 = arith.constant 0 : index
    %c0_1 = arith.constant 0 : index
    %c0_2 = arith.constant 0 : index
    %0 = vector.load %arg2[%c0, %c0_0, %c0_1, %c0_2] : memref<1x4x4x128xf32, #tpu.memory_space<vmem>>, vector<1x1x4x128xf32>
    %1 = vector.shape_cast %0 : vector<1x1x4x128xf32> to vector<4x128xf32>
    %c0_3 = arith.constant 0 : index
    %c1 = arith.constant 1 : index
    %c0_4 = arith.constant 0 : index
    %c0_5 = arith.constant 0 : index
    %2 = vector.load %arg2[%c0_3, %c1, %c0_4, %c0_5] : memref<1x4x4x128xf32, #tpu.memory_space<vmem>>, vector<1x1x4x128xf32>
    %3 = vector.shape_cast %2 : vector<1x1x4x128xf32> to vector<4x128xf32>
    %c0_6 = arith.constant 0 : index
    %c2 = arith.constant 2 : index
    %c0_7 = arith.constant 0 : index
    %c0_8 = arith.constant 0 : index
    %4 = vector.load %arg2[%c0_6, %c2, %c0_7, %c0_8] : memref<1x4x4x128xf32, #tpu.memory_space<vmem>>, vector<1x1x4x128xf32>
    %5 = vector.shape_cast %4 : vector<1x1x4x128xf32> to vector<4x128xf32>
    %c0_9 = arith.constant 0 : index
    %c3 = arith.constant 3 : index
    %c0_10 = arith.constant 0 : index
    %c0_11 = arith.constant 0 : index
    %6 = vector.load %arg2[%c0_9, %c3, %c0_10, %c0_11] : memref<1x4x4x128xf32, #tpu.memory_space<vmem>>, vector<1x1x4x128xf32>
    %7 = vector.shape_cast %6 : vector<1x1x4x128xf32> to vector<4x128xf32>
    %c0_12 = arith.constant 0 : index
    %c0_13 = arith.constant 0 : index
    %8 = memref.load %arg3[%c0_12, %c0_13] : memref<1x4xf32, #tpu.memory_space<smem>>
    %9 = vector.broadcast %8 : f32 to vector<4x128xf32>
    %10 = arith.mulf %9, %1 : vector<4x128xf32>
    %c0_14 = arith.constant 0 : index
    %11 = memref.load %arg4[%c0_14] : memref<1xf32, #tpu.memory_space<smem>>
    %12 = vector.broadcast %11 : f32 to vector<4x128xf32>
    %13 = arith.addf %10, %12 : vector<4x128xf32>
    %c0_15 = arith.constant 0 : index
    %c1_16 = arith.constant 1 : index
    %14 = memref.load %arg3[%c0_15, %c1_16] : memref<1x4xf32, #tpu.memory_space<smem>>
    %15 = vector.broadcast %14 : f32 to vector<4x128xf32>
    %16 = arith.mulf %15, %3 : vector<4x128xf32>
    %17 = arith.addf %13, %16 : vector<4x128xf32>
    %c0_17 = arith.constant 0 : index
    %c2_18 = arith.constant 2 : index
    %18 = memref.load %arg3[%c0_17, %c2_18] : memref<1x4xf32, #tpu.memory_space<smem>>
    %19 = vector.broadcast %18 : f32 to vector<4x128xf32>
    %20 = arith.mulf %19, %5 : vector<4x128xf32>
    %21 = arith.addf %17, %20 : vector<4x128xf32>
    %c0_19 = arith.constant 0 : index
    %c3_20 = arith.constant 3 : index
    %22 = memref.load %arg3[%c0_19, %c3_20] : memref<1x4xf32, #tpu.memory_space<smem>>
    %23 = vector.broadcast %22 : f32 to vector<4x128xf32>
    %24 = arith.mulf %23, %7 : vector<4x128xf32>
    %25 = arith.addf %21, %24 : vector<4x128xf32>
    %cst = arith.constant 0.000000e+00 : f32
    %26 = vector.broadcast %cst : f32 to vector<4x128xf32>
    %27 = arith.maximumf %25, %26 : vector<4x128xf32>
    %c0_21 = arith.constant 0 : index
    %c0_22 = arith.constant 0 : index
    %28 = memref.load %arg5[%c0_21, %c0_22] : memref<4x1xf32, #tpu.memory_space<smem>>
    %29 = vector.broadcast %28 : f32 to vector<4x128xf32>
    %30 = arith.mulf %29, %27 : vector<4x128xf32>
    %c0_23 = arith.constant 0 : index
    %31 = memref.load %arg6[%c0_23] : memref<4xf32, #tpu.memory_space<smem>>
    %32 = vector.broadcast %31 : f32 to vector<4x128xf32>
    %33 = arith.addf %30, %32 : vector<4x128xf32>
    %cst_24 = arith.constant 5.000000e-01 : f32
    %34 = vector.broadcast %cst_24 : f32 to vector<4x128xf32>
    %35 = arith.mulf %34, %33 : vector<4x128xf32>
    %36 = math.tanh %35 : vector<4x128xf32>
    %cst_25 = arith.constant 5.000000e-01 : f32
    %37 = vector.broadcast %cst_25 : f32 to vector<4x128xf32>
    %38 = arith.mulf %37, %36 : vector<4x128xf32>
    %cst_26 = arith.constant 5.000000e-01 : f32
    %39 = vector.broadcast %cst_26 : f32 to vector<4x128xf32>
    %40 = arith.addf %38, %39 : vector<4x128xf32>
    %c0_27 = arith.constant 0 : index
    %c0_28 = arith.constant 0 : index
    %c0_29 = arith.constant 0 : index
    %c0_30 = arith.constant 0 : index
    %41 = vector.load %arg7[%c0_27, %c0_28, %c0_29, %c0_30] : memref<1x4x4x128xf32, #tpu.memory_space<vmem>>, vector<1x1x4x128xf32>
    %42 = vector.shape_cast %41 : vector<1x1x4x128xf32> to vector<4x128xf32>
    %43 = vector.shape_cast %40 : vector<4x128xf32> to vector<1x1x4x128xf32>
    tpu.vector_store %arg7[%c0_27, %c0_28, %c0_29, %c0_30], %43 {strides = array<i32>} : memref<1x4x4x128xf32, #tpu.memory_space<vmem>>, vector<1x1x4x128xf32>,
    %c1_31 = arith.constant 1 : index
    %c0_32 = arith.constant 0 : index
    %44 = memref.load %arg5[%c1_31, %c0_32] : memref<4x1xf32, #tpu.memory_space<smem>>
    %45 = vector.broadcast %44 : f32 to vector<4x128xf32>
    %46 = arith.mulf %45, %27 : vector<4x128xf32>
    %c1_33 = arith.constant 1 : index
    %47 = memref.load %arg6[%c1_33] : memref<4xf32, #tpu.memory_space<smem>>
    %48 = vector.broadcast %47 : f32 to vector<4x128xf32>
    %49 = arith.addf %46, %48 : vector<4x128xf32>
    %cst_34 = arith.constant 5.000000e-01 : f32
    %50 = vector.broadcast %cst_34 : f32 to vector<4x128xf32>
    %51 = arith.mulf %50, %49 : vector<4x128xf32>
    %52 = math.tanh %51 : vector<4x128xf32>
    %cst_35 = arith.constant 5.000000e-01 : f32
    %53 = vector.broadcast %cst_35 : f32 to vector<4x128xf32>
    %54 = arith.mulf %53, %52 : vector<4x128xf32>
    %cst_36 = arith.constant 5.000000e-01 : f32
    %55 = vector.broadcast %cst_36 : f32 to vector<4x128xf32>
    %56 = arith.addf %54, %55 : vector<4x128xf32>
    %c0_37 = arith.constant 0 : index
    %c1_38 = arith.constant 1 : index
    %c0_39 = arith.constant 0 : index
    %c0_40 = arith.constant 0 : index
    %57 = vector.load %arg7[%c0_37, %c1_38, %c0_39, %c0_40] : memref<1x4x4x128xf32, #tpu.memory_space<vmem>>, vector<1x1x4x128xf32>
    %58 = vector.shape_cast %57 : vector<1x1x4x128xf32> to vector<4x128xf32>
    %59 = vector.shape_cast %56 : vector<4x128xf32> to vector<1x1x4x128xf32>
    tpu.vector_store %arg7[%c0_37, %c1_38, %c0_39, %c0_40], %59 {strides = array<i32>} : memref<1x4x4x128xf32, #tpu.memory_space<vmem>>, vector<1x1x4x128xf32>,
    %c2_41 = arith.constant 2 : index
    %c0_42 = arith.constant 0 : index
    %60 = memref.load %arg5[%c2_41, %c0_42] : memref<4x1xf32, #tpu.memory_space<smem>>
    %61 = vector.broadcast %60 : f32 to vector<4x128xf32>
    %62 = arith.mulf %61, %27 : vector<4x128xf32>
    %c2_43 = arith.constant 2 : index
    %63 = memref.load %arg6[%c2_43] : memref<4xf32, #tpu.memory_space<smem>>
    %64 = vector.broadcast %63 : f32 to vector<4x128xf32>
    %65 = arith.addf %62, %64 : vector<4x128xf32>
    %cst_44 = arith.constant 5.000000e-01 : f32
    %66 = vector.broadcast %cst_44 : f32 to vector<4x128xf32>
    %67 = arith.mulf %66, %65 : vector<4x128xf32>
    %68 = math.tanh %67 : vector<4x128xf32>
    %cst_45 = arith.constant 5.000000e-01 : f32
    %69 = vector.broadcast %cst_45 : f32 to vector<4x128xf32>
    %70 = arith.mulf %69, %68 : vector<4x128xf32>
    %cst_46 = arith.constant 5.000000e-01 : f32
    %71 = vector.broadcast %cst_46 : f32 to vector<4x128xf32>
    %72 = arith.addf %70, %71 : vector<4x128xf32>
    %c0_47 = arith.constant 0 : index
    %c2_48 = arith.constant 2 : index
    %c0_49 = arith.constant 0 : index
    %c0_50 = arith.constant 0 : index
    %73 = vector.load %arg7[%c0_47, %c2_48, %c0_49, %c0_50] : memref<1x4x4x128xf32, #tpu.memory_space<vmem>>, vector<1x1x4x128xf32>
    %74 = vector.shape_cast %73 : vector<1x1x4x128xf32> to vector<4x128xf32>
    %75 = vector.shape_cast %72 : vector<4x128xf32> to vector<1x1x4x128xf32>
    tpu.vector_store %arg7[%c0_47, %c2_48, %c0_49, %c0_50], %75 {strides = array<i32>} : memref<1x4x4x128xf32, #tpu.memory_space<vmem>>, vector<1x1x4x128xf32>,
    %c3_51 = arith.constant 3 : index
    %c0_52 = arith.constant 0 : index
    %76 = memref.load %arg5[%c3_51, %c0_52] : memref<4x1xf32, #tpu.memory_space<smem>>
    %77 = vector.broadcast %76 : f32 to vector<4x128xf32>
    %78 = arith.mulf %77, %27 : vector<4x128xf32>
    %c3_53 = arith.constant 3 : index
    %79 = memref.load %arg6[%c3_53] : memref<4xf32, #tpu.memory_space<smem>>
    %80 = vector.broadcast %79 : f32 to vector<4x128xf32>
    %81 = arith.addf %78, %80 : vector<4x128xf32>
    %cst_54 = arith.constant 5.000000e-01 : f32
    %82 = vector.broadcast %cst_54 : f32 to vector<4x128xf32>
    %83 = arith.mulf %82, %81 : vector<4x128xf32>
    %84 = math.tanh %83 : vector<4x128xf32>
    %cst_55 = arith.constant 5.000000e-01 : f32
    %85 = vector.broadcast %cst_55 : f32 to vector<4x128xf32>
    %86 = arith.mulf %85, %84 : vector<4x128xf32>
    %cst_56 = arith.constant 5.000000e-01 : f32
    %87 = vector.broadcast %cst_56 : f32 to vector<4x128xf32>
    %88 = arith.addf %86, %87 : vector<4x128xf32>
    %c0_57 = arith.constant 0 : index
    %c3_58 = arith.constant 3 : index
    %c0_59 = arith.constant 0 : index
    %c0_60 = arith.constant 0 : index
    %89 = vector.load %arg7[%c0_57, %c3_58, %c0_59, %c0_60] : memref<1x4x4x128xf32, #tpu.memory_space<vmem>>, vector<1x1x4x128xf32>
    %90 = vector.shape_cast %89 : vector<1x1x4x128xf32> to vector<4x128xf32>
    %91 = vector.shape_cast %88 : vector<4x128xf32> to vector<1x1x4x128xf32>
    tpu.vector_store %arg7[%c0_57, %c3_58, %c0_59, %c0_60], %91 {strides = array<i32>} : memref<1x4x4x128xf32, #tpu.memory_space<vmem>>, vector<1x1x4x128xf32>,
    return
  }
  func.func @transform_0(%arg0: i32, %arg1: i32) -> (i32, i32, i32, i32) {
    %c0_i32 = arith.constant 0 : i32
    %c0_i32_0 = arith.constant 0 : i32
    %c0_i32_1 = arith.constant 0 : i32
    return %arg0, %c0_i32, %arg1, %c0_i32_0 : i32, i32, i32, i32
  }
  func.func @transform_1(%arg0: i32, %arg1: i32) -> (i32, i32) {
    %c0_i32 = arith.constant 0 : i32
    %c0_i32_0 = arith.constant 0 : i32
    %c0_i32_1 = arith.constant 0 : i32
    return %c0_i32, %c0_i32_0 : i32, i32
  }
  func.func @transform_2(%arg0: i32, %arg1: i32) -> i32 {
    %c0_i32 = arith.constant 0 : i32
    %c0_i32_0 = arith.constant 0 : i32
    return %c0_i32 : i32
  }
  func.func @transform_3(%arg0: i32, %arg1: i32) -> (i32, i32) {
    %c0_i32 = arith.constant 0 : i32
    %c0_i32_0 = arith.constant 0 : i32
    %c0_i32_1 = arith.constant 0 : i32
    return %c0_i32, %c0_i32_0 : i32, i32
  }
  func.func @transform_4(%arg0: i32, %arg1: i32) -> i32 {
    %c0_i32 = arith.constant 0 : i32
    %c0_i32_0 = arith.constant 0 : i32
    return %c0_i32 : i32
  }
  func.func @transform_5(%arg0: i32, %arg1: i32) -> (i32, i32, i32, i32) {
    %c0_i32 = arith.constant 0 : i32
    %c0_i32_0 = arith.constant 0 : i32
    %c0_i32_1 = arith.constant 0 : i32
    return %arg0, %c0_i32, %arg1, %c0_i32_0 : i32, i32, i32, i32
  }
}

</mosaic_0001>

<bundles_post_ra>
// kernel: tpu_custom_call.1
= control target key start
LH: loop header
LB: loop body
LE: loop exit
PB: predicated region body
PF: predicated region fallthrough
CT: control target
= control target key end

     0   :  { %s1096_s0 = inlined_call_operand.hbm [shape: f32[2,4,4,128], index: 0, kind: input, shape index: {}]   ;;  %s1097_s1 = inlined_call_operand.vmem [shape: f32[1,4], index: 1, kind: input, shape index: {}]   ;;  %s1098_s2 = inlined_call_operand.<no memory space> [shape: f32[1], index: 2, kind: input, shape index: {}]   ;;  %s1099_s3 = inlined_call_operand.vmem [shape: f32[4,1], index: 3, kind: input, shape index: {}]   ;;  %s1100_s4 = inlined_call_operand.vmem [shape: f32[4], index: 4, kind: input, shape index: {}]   ;;  %s1101_s5 = inlined_call_operand.hbm [shape: f32[2,4,4,128], index: 5, kind: output, shape index: {}]  }
   0x1   :  { %10 = sst [smem:[#allocation2]] %s1098_s2 }
   0x2   :  { %11 = vsyncpa [#allocation4], 0 }
   0x3   :  { %13 = vsyncpa [#allocation4 + $0x1], 0 }
   0x4   :  { %14 = vsyncpa [#allocation6], 0 }
   0x5   :  { %15 = vsyncpa [#allocation9], 0 }
   0x6   :  { %16 = vsyncpa [#allocation5], 0 }
   0x7   :  { %18 = vsyncpa [#allocation5 + $0x1], 0  ;;  %s856_s20 = smov 0   ;;  %s858_s21 = smov 0  }
   0x8   :  { %s860_s22 = smov 0   ;;  %s862_s23 = smov 0  }
   0x9   :  { %s864_s24 = smov 0   ;;  %s866_s25 = smov 0  }
   0xa LB: > { %s504_s2 = sadd.s32 4294967295, %s812_s25   ;;  %s505_s26 = sadd.s32 4294967294, %s812_s25   ;;  %s812_s25 = sphi %s866_s25, %s24_s25   ;;  %s808_s24 = sphi %s864_s24, %s1124_s24   ;;  %s804_s23 = sphi %s862_s23, %s1123_s23   ;;  %s800_s22 = sphi %s860_s22, %s1122_s22   ;;  %s796_s21 = sphi %s858_s21, %s1121_s21   ;;  %s792_s20 = sphi %s856_s20, %s1120_s20  }
   0xb   : > { %p58_p0 = scmp.ne.s32.totalorder %s796_s21, %s792_s20  ;;  %p890_p1 = scmp.eq.s32.totalorder %s504_s2, 0 }
   0xc   : > { %p894_p2 = scmp.eq.s32.totalorder %s504_s2, 1  ;;  %p174_p3 = scmp.eq.s32.totalorder %s505_s26, 1 }
   0xd   : > { %s1106_s27 = scalar_select %p890_p1, 1, 0 }
   0xe   : > { %s1107_s28 = scalar_select %p894_p2, 1, 0 }
   0xf   : > { %p900_p4 = por %p890_p1, %p58_p0  ;;  %p506_p5 = scmp.ge.s32.totalorder %s812_s25, 1 }
  0x10   : > { %p905_p6 = por %p174_p3, %p58_p0  ;;  %p181_p7 = scmp.lt.s32.totalorder %s812_s25, 3 }
  0x11   : > { %s1108_s29 = scalar_select %p900_p4, 1, 0 }
  0x12   : > { %s1109_s30 = scalar_select %p905_p6, 1, 0 }
  0x13   : > { %s208_s8 = sshll.u32 %s1099_s3, 4  ;;  %p913_p8 = pnand %p506_p5, %p181_p7  ;;  %s209_s8 = int_to_ptr.vmem [resolvable:$true] %s208_s8 }
  0x14   : > { %s194_s12 = sshll.u32 %s1097_s1, 4  ;;  %s219_s16 = sshll.u32 %s1100_s4, 4  ;;  %s195_s12 = int_to_ptr.vmem [resolvable:$true] %s194_s12  ;;  %s932_s16 = int_to_ptr.vmem [resolvable:$true] %s219_s16 }
  0x15   : > { %s1110_s9 = scalar_select %p913_p8, 1, 0 }
  0x16   : > { %p558_p10 = pneg %p913_p8  ;;  %s647_s17 = scalar_lea.vmem %s209_s8, 64 }
  0x17   : > { %p648_p12 = scmp.ne.s32.totalorder %s209_s8, %s647_s17  ;;  %p655_p5 = scmp.lt.s32.totalorder %s209_s8, %s209_s8 }
  0x18   : > { %p925_p11 = pnand %p558_p10, %p890_p1  ;;  %p656_p7 = scmp.lt.s32.totalorder %s647_s17, %s647_s17 }
  0x1a   : > { %p649_p13 = pneg %p925_p11  ;;  %p657_p10 = por %p656_p7, %p655_p5 }
  0x1c   : > { %p650_p0 = pnand %p649_p13, %p648_p12 }
  0x1e   : > { %p651_p3 = pneg %p650_p0 }
  0x20   : > { %p658_p9 = pnand %p657_p10, %p651_p3 }
  0x22   : > { %661 = shalt.err (!%p658_p9)
}
  0x23   : > { %s814_s18 = smov [#allocation8]   ;;  %s662_s19 = scalar_lea.vmem %s195_s12, 16 }
  0x24   : > { %564 = dma.vmem_to_smem (!%p925_p11), %s209_s8, 64, %s814_s18, [#allocation9]  }
  0x25   : > { %p663_p6 = scmp.ne.s32.totalorder %s195_s12, %s662_s19  ;;  %p670_p8 = scmp.lt.s32.totalorder %s195_s12, %s195_s12 }
  0x26   : > { %p671_p2 = scmp.lt.s32.totalorder %s662_s19, %s662_s19 }
  0x27   : > { %p665_p1 = pnand %p663_p6, %p649_p13 }
  0x28   : > { %p672_p12 = por %p671_p2, %p670_p8 }
  0x29   : > { %p666_p4 = pneg %p665_p1 }
  0x2b   : > { %p673_p0 = pnand %p672_p12, %p666_p4 }
  0x2d   : > { %676 = shalt.err (!%p673_p0)
}
  0x2e   : > { %s815_s2 = smov [#allocation7]   ;;  %s677_s26 = scalar_lea.vmem %s932_s16, 16 }
  0x2f   : > { %561 = dma.vmem_to_smem (!%p925_p11), %s195_s12, 16, %s815_s2, [#allocation6]  }
  0x30   : > { %p678_p9 = scmp.ne.s32.totalorder %s932_s16, %s677_s26  ;;  %p685_p1 = scmp.lt.s32.totalorder %s932_s16, %s932_s16 }
  0x31   : > { %p686_p5 = scmp.lt.s32.totalorder %s677_s26, %s677_s26 }
  0x32   : > { %p680_p3 = pnand %p678_p9, %p649_p13 }
  0x33   : > { %p687_p2 = por %p686_p5, %p685_p1 }
  0x34   : > { %p681_p6 = pneg %p680_p3 }
  0x36   : > { %p688_p4 = pnand %p687_p2, %p681_p6 }
  0x38   : > { %691 = shalt.err (!%p688_p4)
}
  0x39   : > { %s816_s6 = smov [#allocation10]   ;;  %s45_s7 = sadd.s32 1, %s800_s22 }
  0x3a   : > { %567 = dma.vmem_to_smem (!%p925_p11), %s932_s16, 16, %s816_s6, [#allocation9]  }
  0x3b   : > { %s36_s8 = sadd.s32 1, %s808_s24  ;;  %p52_p8 = scmp.ne.s32.totalorder %s800_s22, %s796_s21 }
  0x3c   : > { %p38_p13 = scmp.ge.s32.totalorder %s36_s8, 2  ;;  %p53_p7 = scmp.eq.s32.totalorder %s812_s25, 0 }
  0x3d   : > { %p1112_p10 = scmp.ne.s32.totalorder %s1107_s28, 0  ;;  %p579_p0 = scmp.lt.s32.totalorder %s812_s25, 2 }
  0x3e   : > { %s1126_s8 = smov (%p38_p13, %s36_s8), 0  ;;  %p54_p9 = por %p53_p7, %p52_p8 }
  0x3f   : > { %p963_p12 = por %p1112_p10, %p52_p8  ;;  %s230_s11 = sand.u32 1, %s800_s22  }
  0x40   : > { %s40_s12 = ssub.s32 %s808_s24, %s1126_s8  ;;  %s511_s13 = sshll.u32 %s230_s11, 4 }
  0x41   : > { %p43_p3 = scmp.eq.s32.totalorder %s40_s12, 0  ;;  %s540_s14 = sshll.u32 %s808_s24, 8 }
  0x42   : > { %s980_s28 = scalar_lea.hbm %s1096_s0, %s540_s14  ;;  %s234_s18 = scalar_lea.vmem [#allocation3], %s511_s13 }
  0x43   : > { %s975_s15 = scalar_select %p43_p3, %s800_s22, %s45_s7  }
  0x44   : > { %s242_s19 = sshll.u32 %s234_s18, 4  ;;  %p986_p11 = pnand %p579_p0, %p54_p9  ;;  %s982_s19 = int_to_ptr.vmem [resolvable:$true] %s242_s19 }
  0x45   : > { %s990_s26 = scalar_lea.sflag [#allocation4], %s230_s11  ;;  %s692_s6 = scalar_lea.hbm %s980_s28, 256 }
  0x46   : > { %p693_p6 = scmp.ne.s32.totalorder %s980_s28, %s692_s6  ;;  %p694_p1 = pneg %p986_p11 }
  0x47   : > { %s697_s13 = scalar_lea.hbm %s1096_s0, 512  ;;  %p698_p4 = scmp.lt.u32.totalorder %s980_s28, %s1096_s0 }
  0x48   : > { %p695_p5 = pnand %p694_p1, %p693_p6  ;;  %p699_p8 = scmp.lt.u32.totalorder %s697_s13, %s692_s6 }
  0x49   : > { %p701_p7 = scmp.lt.u32.totalorder %s692_s6, %s980_s28 }
  0x4a   : > { %p696_p2 = pneg %p695_p5  ;;  %p700_p13 = por %p699_p8, %p698_p4 }
  0x4c   : > { %p702_p10 = por %p701_p7, %p700_p13 }
  0x4e   : > { %p703_p0 = pnand %p702_p10, %p696_p2 }
  0x50   : > { %706 = shalt.err (!%p703_p0)
}
  0x51   : > { %s707_s11 = scalar_lea.vmem %s982_s19, 256  ;;  %s817_s17 = smov [#allocation3]  }
  0x52   : > { %p708_p9 = scmp.ne.s32.totalorder %s982_s19, %s707_s11  ;;  %s712_s18 = sshll.u32 %s817_s17, 4  ;;  %s713_s18 = int_to_ptr.vmem [resolvable:$false] %s712_s18 }
  0x53   : > { %s714_s7 = scalar_lea.vmem %s713_s18, 512  ;;  %p715_p5 = scmp.lt.s32.totalorder %s982_s19, %s713_s18 }
  0x54   : > { %p710_p3 = pnand %p708_p9, %p694_p1  ;;  %p716_p4 = scmp.lt.s32.totalorder %s714_s7, %s707_s11 }
  0x56   : > { %p711_p6 = pneg %p710_p3  ;;  %p717_p8 = por %p716_p4, %p715_p5 }
  0x58   : > { %p718_p13 = pnand %p717_p8, %p711_p6 }
  0x5a   : > { %721 = shalt.err (!%p718_p13)
}
  0x5b   : > { %s818_s6 = smov 64   ;;  %s819_s12 = smov 4  }
  0x5c   : > { %571 = dma.hbm_to_vmem [thread:$0]  (!%p986_p11), %s980_s28, 256, %s982_s19, %s990_s26, %s818_s6, %s818_s6, %s819_s12  }
  0x5d   : > { %p1115_p1 = scmp.ne.s32.totalorder %s1110_s9, 0 }
  0x5e   : > { %s1021_s13 = sand.u32 (!%p1115_p1), 1, %s796_s21   ;;  %p1116_p2 = scmp.ne.s32.totalorder (!%p1115_p1), %s1108_s29, 0 }
  0x5f   : > { %254 = sbr.rel (%p1115_p1) target bundleno = 168 (0xa8), region = 40  ;;  %s515_s14 = sshll.u32 (!%p1115_p1), %s1021_s13, 4 }
  0x60   : > { %s257_s16 = scalar_lea.sflag (!%p1115_p1), [#allocation4], %s1021_s13  ;;  %s260_s11 = scalar_lea.vmem (!%p1115_p1), [#allocation3], %s515_s14 }
  0x66   : > { %775 = dma.done.wait (%p1116_p2), %s257_s16, 256  }
  0x67   : > { %777 = vsyncadd (%p1116_p2), %s257_s16, 4294967040  ;;  %p1117_p11 = scmp.ne.s32.totalorder %s1106_s27, 0 }
  0x69   : > { %779 = dma.done.wait (%p1117_p11), [#allocation6], 16  }
  0x6a   : > { %781 = vsyncadd (%p1117_p11), [#allocation6], 4294967280 }
  0x6b   : > { %783 = dma.done.wait (%p1117_p11), [#allocation9], 80  }
  0x6c   : > { %785 = vsyncadd (%p1117_p11), [#allocation9], 4294967216 }
  0x6d   : > { %277 = sfence }
  0x6e   : > { %s307_s9 = sld [smem:[#allocation7]]  ;;  %s523_s19 = sld [smem:[#allocation7 + $0x1]]  ;;  %v300_v0 = vld [vmem:[%s260_s11] sm:$0xf]  ;;  %v520_v1 = vld [vmem:[%s260_s11 + $0x4] sm:$0xf] }
  0x6f   : > { %s310_s28 = sld [smem:[#allocation2]]  ;;  %s524_s2 = sld [smem:[#allocation7 + $0x2]]  ;;  %v521_v2 = vld [vmem:[%s260_s11 + $0x8] sm:$0xf]  ;;  %v522_v7 = vld [vmem:[%s260_s11 + $0xc] sm:$0xf] }
  0x70   : > { %s525_s26 = sld [smem:[#allocation7 + $0x3]]  ;;  %s326_s29 = sld [smem:[#allocation8]] }
  0x71   : > { %s526_s17 = sld [smem:[#allocation8 + $0x80]]  ;;  %s527_s6 = sld [smem:[#allocation10 + $0x1]] }
  0x72   : > { %s529_s27 = sld [smem:[#allocation8 + $0x100]]  ;;  %s530_s12 = sld [smem:[#allocation10 + $0x2]] }
  0x73   : > { %s532_s18 = sld [smem:[#allocation8 + $0x180]]  ;;  %s533_s16 = sld [smem:[#allocation10 + $0x3]] }
  0x74   : > { %v308_v3 = vstv %s307_s9  ;;  %v314_v6 = vstv %s523_s19  ;;  %s329_s7 = sld [smem:[#allocation10]]  ;;  %s299_s11 = scalar_lea.vmem [#allocation11], %s515_s14 }
  0x75   : > { %v309_v4 = vmul.f32 %v308_v3, %v300_v0  ;;  %v311_v5 = vstv %s310_s28  ;;  %v315_v8 = vmul.f32 %v520_v1, %v314_v6  ;;  %v318_v9 = vstv %s524_s2  ;;  %s388_s9 = sshll.u32 %s299_s11, 4  ;;  %s541_s28 = sshll.u32 %s804_s23, 8  ;;  %s1042_s9 = int_to_ptr.vmem [resolvable:$true] %s388_s9 }
  0x76   : > { %v322_v10 = vstv %s525_s26  ;;  %v319_v12 = vmul.f32 %v521_v2, %v318_v9  ;;  %v327_v17 = vstv %s326_s29  ;;  %s1047_s2 = scalar_lea.hbm %s1101_s5, %s541_s28  ;;  %s374_s26 = scalar_lea.sflag [#allocation5], %s1021_s13 }
  0x77   : > { %v312_v11 = vadd.f32 %v311_v5, %v309_v4  ;;  %v323_v14 = vmul.f32 %v522_v7, %v322_v10  ;;  %v338_v18 = vstv %s526_s17  ;;  %v341_v23 = vstv %s527_s6  ;;  %s722_s23 = scalar_lea.vmem %s1042_s9, 256  ;;  %s820_s29 = smov [#allocation11]  }
  0x78   : > { %v350_v19 = vstv %s529_s27  ;;  %v353_v24 = vstv %s530_s12  ;;  %p723_p7 = scmp.ne.s32.totalorder %s1042_s9, %s722_s23  ;;  %s726_s17 = sshll.u32 %s820_s29, 4  ;;  %s727_s17 = int_to_ptr.vmem [resolvable:$false] %s726_s17 }
  0x79   : > { %v316_v13 = vadd.f32 %v315_v8, %v312_v11  ;;  %v362_v20 = vstv %s532_s18  ;;  %v365_v25 = vstv %s533_s16  ;;  %s728_s27 = scalar_lea.vmem %s727_s17, 512  ;;  %p729_p9 = scmp.lt.s32.totalorder %s1042_s9, %s727_s17 }
  0x7a   : > { %v330_v22 = vstv %s329_s7  ;;  %p724_p10 = pnand %p723_p7, %p963_p12  ;;  %p730_p3 = scmp.lt.s32.totalorder %s728_s27, %s722_s23 }
  0x7b   : > { %v320_v15 = vadd.f32 %v319_v12, %v316_v13 }
  0x7c   : > { %p725_p0 = pneg %p724_p10  ;;  %p731_p6 = por %p730_p3, %p729_p9 }
  0x7d   : > { %v324_v16 = vadd.f32 %v323_v14, %v320_v15 }
  0x7e   : > { %p732_p5 = pnand %p731_p6, %p725_p0 }
  0x7f   : > { %v325_v21 = vmax.f32 %v324_v16, 0.0 }
  0x81   : > { %v328_v26 = vmul.f32 %v327_v17, %v325_v21  ;;  %v339_v27 = vmul.f32 %v338_v18, %v325_v21  ;;  %v351_v28 = vmul.f32 %v350_v19, %v325_v21  ;;  %v363_v29 = vmul.f32 %v362_v20, %v325_v21 }
  0x83   : > { %v331_v30 = vadd.f32 %v330_v22, %v328_v26  ;;  %v342_v31 = vadd.f32 %v341_v23, %v339_v27  ;;  %v354_v32 = vadd.f32 %v353_v24, %v351_v28  ;;  %v366_v33 = vadd.f32 %v365_v25, %v363_v29 }
  0x85   : > { %v332_v34 = vmul.f32 0.5, %v331_v30  ;;  %v343_v35 = vmul.f32 0.5, %v342_v31  ;;  %v355_v36 = vmul.f32 0.5, %v354_v32  ;;  %v367_v37 = vmul.f32 0.5, %v366_v33 }
  0x87   : > { %639 = vtanh.f32 %v332_v34 }
  0x88   : > { %641 = vtanh.f32 %v343_v35 }
  0x89   : > { %643 = vtanh.f32 %v355_v36 }
  0x8a   : > { %645 = vtanh.f32 %v367_v37 }
  0x91   : > { %v640_v38 = vpop.eup %639 }
  0x92   : > { %v642_v39 = vpop.eup %641  ;;  %v334_v40 = vmul.f32 0.5, %v640_v38 }
  0x93   : > { %v644_v41 = vpop.eup %643  ;;  %v345_v42 = vmul.f32 0.5, %v642_v39 }
  0x94   : > { %v646_v43 = vpop.eup %645  ;;  %v335_v44 = vadd.f32 0.5, %v334_v40  ;;  %v357_v45 = vmul.f32 0.5, %v644_v41 }
  0x95   : > { %v346_v46 = vadd.f32 0.5, %v345_v42  ;;  %v369_v47 = vmul.f32 0.5, %v646_v43 }
  0x96   : > { %336 = vst [vmem:[%s299_s11] sm:$0xf] %v335_v44  ;;  %v358_v48 = vadd.f32 0.5, %v357_v45 }
  0x97   : > { %528 = vst [vmem:[%s299_s11 + $0x4] sm:$0xf] %v346_v46  ;;  %v370_v49 = vadd.f32 0.5, %v369_v47 }
  0x98   : > { %531 = vst [vmem:[%s299_s11 + $0x8] sm:$0xf] %v358_v48 }
  0x99   : > { %534 = vst [vmem:[%s299_s11 + $0xc] sm:$0xf] %v370_v49 }
  0x9a   : > { %735 = shalt.err (!%p732_p5)
}
  0x9b   : > { %s736_s18 = scalar_lea.hbm %s1047_s2, 256  ;;  %s740_s12 = scalar_lea.hbm %s1101_s5, 512 }
  0x9c   : > { %p737_p4 = scmp.ne.s32.totalorder %s1047_s2, %s736_s18  ;;  %p741_p1 = scmp.lt.u32.totalorder %s1047_s2, %s1101_s5 }
  0x9d   : > { %p742_p2 = scmp.lt.u32.totalorder %s740_s12, %s736_s18  ;;  %p744_p7 = scmp.lt.u32.totalorder %s736_s18, %s1047_s2 }
  0x9e   : > { %p738_p8 = pnand %p737_p4, %p963_p12 }
  0x9f   : > { %p743_p11 = por %p742_p2, %p741_p1 }
  0xa0   : > { %p739_p13 = pneg %p738_p8 }
  0xa1   : > { %p745_p10 = por %p744_p7, %p743_p11 }
  0xa3   : > { %p746_p0 = pnand %p745_p10, %p739_p13 }
  0xa5   : > { %749 = shalt.err (!%p746_p0)
}
  0xa6   : > { %s821_s28 = smov 64   ;;  %s822_s14 = smov 4  }
  0xa7   : > { %556 = dma.vmem_to_hbm [thread:$0]  (%p963_p12), %s1042_s9, 256, %s1047_s2, %s374_s26, %s821_s28, %s821_s28, %s822_s14  }
  0xa8 PF: > { %s403_s19 = sand.u32 1, %s792_s20   ;;  %p1118_p9 = scmp.ne.s32.totalorder %s1109_s30, 0 }
  0xa9   : > { %p1119_p3 = scmp.ge.s32.totalorder %s812_s25, 2  ;;  %s404_s23 = scalar_lea.sflag [#allocation5], %s403_s19 }
  0xab   : > { %p573_p6 = pnand %p1119_p3, %p1118_p9 }
  0xad   : > { %787 = dma.done.wait (!%p573_p6), %s404_s23, 256  }
  0xae   : > { %789 = vsyncadd (!%p573_p6), %s404_s23, 4294967040  ;;  %s24_s25 = sadd.s32 1, %s812_s25   ;;  %s1120_s20 = smov %s796_s21 }
  0xaf   : > { %p21_p5 = scmp.ge.s32.totalorder %s24_s25, 4   ;;  %s1121_s21 = smov %s800_s22 }
  0xb0   : > { %s1122_s22 = smov %s975_s15  ;;  %s1123_s23 = smov %s808_s24 }
  0xb1   : > { %s1124_s24 = smov %s1126_s8  ;;  %23 = sbr.rel (!%p21_p5) target bundleno = 10 (0xa), region = 104 }
  0xb8   :  { %409 = vsyncpa [#allocation4], 1 }
  0xb9   :  { %411 = vsyncpa [#allocation4 + $0x1], 1 }
  0xba   :  { %412 = vsyncpa [#allocation5], 1 }
  0xbb   :  { %414 = vsyncpa [#allocation5 + $0x1], 1 }
  0xbc   :  { %415 = vsyncpa [#allocation6], 1 }
  0xbd   :  { %417 = vsyncpa [#allocation6 + $0x1], 1 }
  0xbe   :  { %418 = vsyncpa [#allocation9], 1 }

</bundles_post_ra>
